<compile_context>
chip_gen: v5e
topology: v5e:2x2
jax: 0.10.0
libtpu: 0.0.40
codegen_flags: <defaults>
</compile_context>

<pallas_src>
import math
from functools import partial

import jax
import jax.numpy as jnp
from jax import lax
from jax.experimental import pallas as pl
from jax.experimental.pallas import tpu as pltpu


def _round_up(x, m):
    return ((x + m - 1) // m) * m


# ------------------- Kernel 1: head-split linear projection ------------------
def _proj_kernel(x_ref, wT_ref, b_ref, o_ref, *, scale):
    # x_ref:  (1, TS, D)      bf16 input rows (one batch, one row tile)
    # wT_ref: (1, D, d_k)     bf16 pre-transposed weight columns of one head
    # b_ref:  (1, 1, d_k)     f32 bias slice of one head
    # o_ref:  (1, 1, TS, d_k) bf16 output in head-split (B, h, S, d_k) layout
    y = jnp.dot(x_ref[0], wT_ref[0], preferred_element_type=jnp.float32)
    y = y + b_ref[0]
    if scale != 1.0:          # fold 1/sqrt(d_k) into the Q projection for free
        y = y * scale
    o_ref[0, 0] = y.astype(o_ref.dtype)


def _project_heads(x, w, b, *, h, d_k, scale, s_pad, ts):
    """x: (B, S, D); w: (D, D) torch Linear weight (out, in); b: (1, D).
    Returns (B, h, s_pad, d_k) bf16 = head-split (x @ w.T + b) * scale."""
    B, S, D = x.shape
    bf16 = jnp.bfloat16

    xp = x.astype(bf16)
    if s_pad > S:
        xp = jnp.pad(xp, ((0, 0), (0, s_pad - S), (0, 0)))

    # Pre-transpose once and split output columns by head:
    #   wT_h[j, c, t] == w.T[c, j*d_k + t]
    wT_h = jnp.transpose(w).reshape(D, h, d_k).transpose(1, 0, 2).astype(bf16)
    b_h = b.reshape(h, 1, d_k).astype(jnp.float32)

    ns = s_pad // ts
    # double-buffered block footprint + headroom
    vmem_need = 2 * (ts * D * 2 + D * d_k * 2 + d_k * 4 + ts * d_k * 2)
    vmem_limit = int(max(vmem_need + (1 << 20), 4 << 20))

    return pl.pallas_call(
        partial(_proj_kernel, scale=scale),
        out_shape=jax.ShapeDtypeStruct((B, h, s_pad, d_k), bf16),
        grid=(B, ns, h),   # head axis innermost: x row-tile stays VMEM-resident
        in_specs=[
            pl.BlockSpec((1, ts, D), lambda bi, si, ji: (bi, si, 0)),
            pl.BlockSpec((1, D, d_k), lambda bi, si, ji: (ji, 0, 0)),
            pl.BlockSpec((1, 1, d_k), lambda bi, si, ji: (ji, 0, 0)),
        ],
        out_specs=pl.BlockSpec((1, 1, ts, d_k),
                               lambda bi, si, ji: (bi, ji, si, 0)),
        compiler_params=pltpu.CompilerParams(
            dimension_semantics=("parallel", "parallel", "parallel"),
            vmem_limit_bytes=vmem_limit),
    )(xp, wT_h, b_h)


# ------------- Kernel 2: per-(batch, head, q-tile) attention probs -----------
def _attn_kernel(q_ref, k_ref, o_ref, *, s_k, s_kp):
    # q_ref: (1, 1, TQ,  d_k) bf16, already scaled by 1/sqrt(d_k)
    # k_ref: (1, 1, Skp, d_k) bf16, rows >= s_k are lane-padding
    # o_ref: (1, 1, TQ,  Skp) out_dtype
    q = q_ref[0, 0]
    k = k_ref[0, 0]
    # (TQ, d_k) x (Skp, d_k) contracting d_k -> (TQ, Skp); no transpose needed.
    s = lax.dot_general(q, k,
                        dimension_numbers=(((1,), (1,)), ((), ())),
                        preferred_element_type=jnp.float32)
    if s_kp > s_k:
        # 1-row lane mask, broadcast over the score tile.
        col = lax.broadcasted_iota(jnp.int32, (1, s_kp), 1)
        s = jnp.where(col < s_k, s, -1e30)

    # Numerically-stable softmax over the key axis (matches F.softmax(dim=-1)).
    s = s - jnp.max(s, axis=-1, keepdims=True)
    e = jnp.exp(s)
    denom = jnp.sum(e, axis=-1, keepdims=True)
    # exact reciprocal so each row sums to ~1 exactly (downstream p @ V safe)
    p = e * pl.reciprocal(denom, approx=False)
    o_ref[0, 0] = p.astype(o_ref.dtype)


# ----------------------------------- wrapper ---------------------------------
def multi_head_attention(query, key, wq, bq, wk, bk, *, h,
                         out_dtype=jnp.bfloat16):
    """query: (B, Sq, D), key: (B, Sk, D); wq/wk: (D, D) PyTorch Linear weights
    (out, in); bq/bk: (1, D).  Returns attention probs (B, h, Sq, Sk)."""
    B, Sq, D = query.shape
    Bk, Sk, Dk = key.shape
    assert B == Bk and D == Dk and D % h == 0
    d_k = D // h
    scale = 1.0 / math.sqrt(d_k)
    out_itemsize = jnp.dtype(out_dtype).itemsize

    # Key axis padded to a multiple of 128 -> lane-dense (unmasked) stores of
    # the probability tile; padded columns masked before softmax.
    Skp = _round_up(Sk, 128)

    # Query-row tile: up to 512, shrink until double-buffered blocks fit budget.
    budget = 24 << 20
    TQ = min(512, _round_up(Sq, 16))
    while TQ > 16 and 2 * (TQ * d_k * 2 + Skp * d_k * 2
                           + TQ * Skp * out_itemsize) > budget:
        TQ = max(16, _round_up(TQ // 2, 16))
    Sqp = _round_up(Sq, TQ)

    # Key-projection row tile (must divide Skp, which is a multiple of 128).
    TSk = 256 if Skp % 256 == 0 else 128

    # Projections land directly in head-split (B, h, S_pad, d_k) layout.
    Q = _project_heads(query, wq, bq, h=h, d_k=d_k, scale=scale,
                       s_pad=Sqp, ts=TQ)
    K = _project_heads(key, wk, bk, h=h, d_k=d_k, scale=1.0,
                       s_pad=Skp, ts=TSk)

    nq = Sqp // TQ
    vmem_need = 2 * (TQ * d_k * 2 + Skp * d_k * 2 + TQ * Skp * out_itemsize)
    vmem_limit = int(max(vmem_need + (1 << 20), 4 << 20))

    probs = pl.pallas_call(
        partial(_attn_kernel, s_k=Sk, s_kp=Skp),
        out_shape=jax.ShapeDtypeStruct((B, h, Sqp, Skp), out_dtype),
        grid=(B, h, nq),   # q-tile axis innermost: K block stays VMEM-resident
        in_specs=[
            pl.BlockSpec((1, 1, TQ, d_k), lambda b, j, qi: (b, j, qi, 0)),
            pl.BlockSpec((1, 1, Skp, d_k), lambda b, j, qi: (b, j, 0, 0)),
        ],
        out_specs=pl.BlockSpec((1, 1, TQ, Skp), lambda b, j, qi: (b, j, qi, 0)),
        compiler_params=pltpu.CompilerParams(
            dimension_semantics=("parallel", "parallel", "parallel"),
            vmem_limit_bytes=vmem_limit),
    )(Q, K)

    if Sqp > Sq or Skp > Sk:
        probs = probs[:, :, :Sq, :Sk]
    return probs


# --------------------------------- reference ---------------------------------
def reference_mha(query, key, wq, bq, wk, bk, *, h):
    """Pure-JAX (f32) reference reproducing the PyTorch forward semantics."""
    B, Sq, D = query.shape
    _, Sk, _ = key.shape
    d_k = D // h
    Q = query @ wq.T + bq.reshape(-1)
    K = key @ wk.T + bk.reshape(-1)
    Q = Q.reshape(B, Sq, h, d_k).transpose(0, 2, 1, 3)
    K = K.reshape(B, Sk, h, d_k).transpose(0, 2, 1, 3)
    scores = jnp.einsum('bhqd,bhkd->bhqk', Q, K) / math.sqrt(d_k)
    return jax.nn.softmax(scores, axis=-1)


if __name__ == "__main__":
    # Small shapes consistent with the module: batch=2, seq=8, d_model=32, h=4
    B, S, D, H = 2, 8, 32, 4

    key0 = jax.random.PRNGKey(0)
    k_q, k_k, k_wq, k_bq, k_wk, k_bk = jax.random.split(key0, 6)

    query = jax.random.normal(k_q, (B, S, D), dtype=jnp.float32)
    keyin = jax.random.normal(k_k, (B, S, D), dtype=jnp.float32)

    # Deterministic parameter init (nn.Linear(d_model, d_model) x 2)
    bound = 1.0 / math.sqrt(D)
    wq = jax.random.uniform(k_wq, (D, D), jnp.float32, -bound, bound)
    bq = jax.random.uniform(k_bq, (1, D), jnp.float32, -bound, bound)
    wk = jax.random.uniform(k_wk, (D, D), jnp.float32, -bound, bound)
    bk = jax.random.uniform(k_bk, (1, D), jnp.float32, -bound, bound)

    out = multi_head_attention(query, keyin, wq, bq, wk, bk, h=H)
    out = jax.block_until_ready(out)

    ref = reference_mha(query, keyin, wq, bq, wk, bk, h=H)
    assert out.shape == (B, H, S, S), out.shape
    # bf16 MXU operands + bf16 probability writeback -> compare against the f32
    # reference with a correspondingly loose tolerance.
    assert jnp.allclose(out.astype(jnp.float32), ref, atol=2e-2, rtol=2e-2), \
        "mismatch vs reference"

    print("KERNEL_OK")
</pallas_src>

<mosaic_0001>
module attributes {stable_mosaic.version = 11 : i64} {
  func.func @_proj_kernel(%arg0: i32, %arg1: i32, %arg2: i32, %arg3: memref<1x16x32xbf16, #tpu.memory_space<vmem>>, %arg4: memref<1x32x8xbf16, #tpu.memory_space<vmem>>, %arg5: memref<1x1x8xf32, #tpu.memory_space<vmem>>, %arg6: memref<1x1x16x8xbf16, #tpu.memory_space<vmem>>) attributes {dimension_semantics = [#tpu.dimension_semantics<parallel>, #tpu.dimension_semantics<parallel>, #tpu.dimension_semantics<parallel>], iteration_bounds = array<i64: 2, 1, 4>, scalar_prefetch = 0 : i64, scratch_operands = 0 : i64, tpu.core_type = #tpu.core_type<tc>, window_params = [{transform_indices = @transform_0, window_bounds = array<i64: 1, 16, 32>}, {transform_indices = @transform_1, window_bounds = array<i64: 1, 32, 8>}, {transform_indices = @transform_2, window_bounds = array<i64: 1, 1, 8>}, {transform_indices = @transform_3, window_bounds = array<i64: 1, 1, 16, 8>}]} {
    %c0 = arith.constant 0 : index
    %c0_0 = arith.constant 0 : index
    %c0_1 = arith.constant 0 : index
    %0 = vector.load %arg3[%c0, %c0_0, %c0_1] : memref<1x16x32xbf16, #tpu.memory_space<vmem>>, vector<1x16x32xbf16>
    %1 = vector.shape_cast %0 : vector<1x16x32xbf16> to vector<16x32xbf16>
    %c0_2 = arith.constant 0 : index
    %c0_3 = arith.constant 0 : index
    %c0_4 = arith.constant 0 : index
    %2 = vector.load %arg4[%c0_2, %c0_3, %c0_4] : memref<1x32x8xbf16, #tpu.memory_space<vmem>>, vector<1x32x8xbf16>
    %3 = vector.shape_cast %2 : vector<1x32x8xbf16> to vector<32x8xbf16>
    %cst = arith.constant dense<0.000000e+00> : vector<16x8xf32>
    %4 = tpu.matmul %1, %3, %cst {dimension_numbers = #tpu.dot_dimension_numbers<[1], [0], [0], [1], [0, 0, 1, 1], [], []>} : vector<16x32xbf16>, vector<32x8xbf16>, vector<16x8xf32> -> vector<16x8xf32>
    %c0_5 = arith.constant 0 : index
    %c0_6 = arith.constant 0 : index
    %c0_7 = arith.constant 0 : index
    %5 = vector.load %arg5[%c0_5, %c0_6, %c0_7] : memref<1x1x8xf32, #tpu.memory_space<vmem>>, vector<1x1x8xf32>
    %6 = vector.shape_cast %5 : vector<1x1x8xf32> to vector<1x8xf32>
    %7 = vector.broadcast %6 : vector<1x8xf32> to vector<16x8xf32>
    %8 = arith.addf %4, %7 : vector<16x8xf32>
    %cst_8 = arith.constant 0.353553385 : f32
    %9 = vector.broadcast %cst_8 : f32 to vector<16x8xf32>
    %10 = arith.mulf %8, %9 : vector<16x8xf32>
    %11 = arith.truncf %10 : vector<16x8xf32> to vector<16x8xbf16>
    %c0_9 = arith.constant 0 : index
    %c0_10 = arith.constant 0 : index
    %c0_11 = arith.constant 0 : index
    %c0_12 = arith.constant 0 : index
    %12 = vector.load %arg6[%c0_9, %c0_10, %c0_11, %c0_12] : memref<1x1x16x8xbf16, #tpu.memory_space<vmem>>, vector<1x1x16x8xbf16>
    %13 = vector.shape_cast %12 : vector<1x1x16x8xbf16> to vector<16x8xbf16>
    %14 = vector.shape_cast %11 : vector<16x8xbf16> to vector<1x1x16x8xbf16>
    tpu.vector_store %arg6[%c0_9, %c0_10, %c0_11, %c0_12], %14 {strides = array<i32>} : memref<1x1x16x8xbf16, #tpu.memory_space<vmem>>, vector<1x1x16x8xbf16>,
    return
  }
  func.func @transform_0(%arg0: i32, %arg1: i32, %arg2: i32) -> (i32, i32, i32) {
    %c0_i32 = arith.constant 0 : i32
    %c0_i32_0 = arith.constant 0 : i32
    return %arg0, %arg1, %c0_i32 : i32, i32, i32
  }
  func.func @transform_1(%arg0: i32, %arg1: i32, %arg2: i32) -> (i32, i32, i32) {
    %c0_i32 = arith.constant 0 : i32
    %c0_i32_0 = arith.constant 0 : i32
    %c0_i32_1 = arith.constant 0 : i32
    return %arg2, %c0_i32, %c0_i32_0 : i32, i32, i32
  }
  func.func @transform_2(%arg0: i32, %arg1: i32, %arg2: i32) -> (i32, i32, i32) {
    %c0_i32 = arith.constant 0 : i32
    %c0_i32_0 = arith.constant 0 : i32
    %c0_i32_1 = arith.constant 0 : i32
    return %arg2, %c0_i32, %c0_i32_0 : i32, i32, i32
  }
  func.func @transform_3(%arg0: i32, %arg1: i32, %arg2: i32) -> (i32, i32, i32, i32) {
    %c0_i32 = arith.constant 0 : i32
    %c0_i32_0 = arith.constant 0 : i32
    return %arg0, %arg2, %arg1, %c0_i32 : i32, i32, i32, i32
  }
}

</mosaic_0001>

<bundles_post_ra>
// kernel: tpu_custom_call.1
= control target key start
LH: loop header
LB: loop body
LE: loop exit
PB: predicated region body
PF: predicated region fallthrough
CT: control target
= control target key end

     0   :  { %s577_s12 = smov 0   ;;  %s579_s13 = smov 0   ;;  %s634_s0 = inlined_call_operand.vmem [shape: bf16[2,16,32], index: 0, kind: input, shape index: {}]   ;;  %s635_s1 = inlined_call_operand.vmem [shape: bf16[4,32,8], index: 1, kind: input, shape index: {}]   ;;  %s636_s2 = inlined_call_operand.vmem [shape: f32[4,1,8], index: 2, kind: input, shape index: {}]   ;;  %s637_s3 = inlined_call_operand.vmem [shape: bf16[2,4,16,8], index: 3, kind: output, shape index: {}]  }
   0x1   :  { %s581_s14 = smov 0   ;;  %s583_s15 = smov 0  }
   0x2   :  { %s585_s16 = smov 0  }
   0x3 LB: > { %s25_s17 = sadd.s32 1, %s547_s14  ;;  %s32_s18 = sadd.s32 1, %s551_s15  ;;  %s555_s16 = sphi %s585_s16, %s13_s16   ;;  %s551_s15 = sphi %s583_s15, %s641_s15   ;;  %s547_s14 = sphi %s581_s14, %s640_s14   ;;  %s543_s13 = sphi %s579_s13, %s639_s13   ;;  %s539_s12 = sphi %s577_s12, %s638_s12  }
   0x4   : > { %p26_p0 = scmp.ge.s32.totalorder %s25_s17, 4  ;;  %p448_p1 = scmp.ge.s32.totalorder %s555_s16, 1 }
   0x5   : > { %p185_p2 = scmp.lt.s32.totalorder %s555_s16, 9 }
   0x6   : > { %s643_s17 = smov (%p26_p0, %s25_s17), 0  ;;  %s645_s18 = smov (!%p26_p0, %s32_s18), %s551_s15 }
   0x7   : > { %p186_p3 = pnand %p448_p1, %p185_p2  ;;  %p34_p4 = scmp.ge.s32.totalorder %s645_s18, 2 }
   0x8   : > { %p239_p5 = scmp.lt.s32.totalorder (!%p186_p3), %s539_s12, 3  ;;  %p230_p6 = scmp.lt.s32.totalorder (!%p186_p3), %s543_s13, 1 }
   0x9   : > { %s647_s18 = smov (%p34_p4, %s645_s18), 0  ;;  %189 = sbr.rel (%p186_p3) target bundleno = 166 (0xa6), region = 32 }
   0xe   : > { %s649_s12 = smov (!%p239_p5, %s539_s12), 3  ;;  %s651_s13 = smov (!%p230_p6, %s543_s13), 1  ;;  %vm289_vm0 = vcmask 261120   ;;  %vm311_vm1 = vcmask 60416  }
   0xf   : > { %s472_s19 = sshll.u32 %s649_s12, 4  ;;  %s453_s20 = sshll.u32 %s649_s12, 1 }
  0x10   : > { %s243_s23 = scalar_lea.vmem %s635_s1, %s472_s19  ;;  %s471_s24 = sshll.u32 %s651_s13, 3 }
  0x11   : > { %v475_v0 = vld [vmem:[%s243_s23 + $0x8] sm:$0xff]  ;;  %s257_s25 = sadd.s32 %s471_s24, %s453_s20  ;;  %s246_s28 = scalar_lea.vmem %s636_s2, %s649_s12  ;;  %v474_v1 = vld [vmem:[%s243_s23] sm:$0xff] }
  0x12   : > { %299 = vmatpush.bf16.msra.mxu0 %v475_v0  ;;  %s237_s4 = scalar_lea.vmem %s634_s0, %s471_s24  ;;  %v516_v3 = vld [vmem:[%s246_s28] ss:$0 sm:$0xff]  ;;  %s455_s5 = sshll.u32 %s257_s25, 2 }
  0x13   : > { %v473_v2 = vld [vmem:[%s237_s4] sm:$0xff]  ;;  %s259_s8 = scalar_lea.vmem %s637_s3, %s455_s5 }
  0x16   : > { %300 = vmatpush.bf16.msra.mxu0 %v474_v1 }
  0x19   : > { %468 = vmatmul.msk.bf16.vlgmr.msra.gmra.mxu0 %vm289_vm0, %v473_v2 }
  0x96   : > { %v302_v4 = vpop.f32.mrf.mxu0 }
  0x97   : > { %v303_v5 = vadd.f32 %v516_v3, %v302_v4 }
  0x99   : > { %v307_v6 = vmul.f32 0.35355338, %v303_v5 }
  0x9b   : > { %v309_v7 = vpack.c.bf16 %v307_v6, %v307_v6 }
  0x9d   : > { %312 = vst.msk [vmem:[%s259_s8] sm:$0xf] %vm311_vm1, %v309_v7 }
  0x9e   : > { %v304_v8 = vpop.f32.mrf.mxu0 }
  0x9f   : > { %v305_v9 = vadd.f32 %v516_v3, %v304_v8 }
  0xa1   : > { %v308_v10 = vmul.f32 0.35355338, %v305_v9 }
  0xa3   : > { %v310_v11 = vpack.c.bf16 %v308_v10, %v308_v10 }
  0xa5   : > { %313 = vst.msk [vmem:[%s259_s8 + $0x4] sm:$0xf] %vm311_vm1, %v310_v11 }
  0xa6 PF: > { %s13_s16 = sadd.s32 1, %s555_s16   ;;  %s638_s12 = smov %s547_s14 }
  0xa7   : > { %p10_p7 = scmp.ge.s32.totalorder %s13_s16, 10   ;;  %s639_s13 = smov %s551_s15 }
  0xa8   : > { %s640_s14 = smov %s643_s17  ;;  %s641_s15 = smov %s647_s18 }
  0xa9   :  { %12 = sbr.rel (!%p10_p7) target bundleno = 3 (0x3), region = 68 }

</bundles_post_ra>
